<compile_context>
chip_gen: v7x
topology: tpu7x:2x2x1
jax: 0.10.0
libtpu: 0.0.40
codegen_flags: <defaults>
</compile_context>

<pallas_src>
import functools
import math

import jax
import jax.numpy as jnp
from jax.experimental import pallas as pl
from jax.experimental.pallas import tpu as pltpu

LANE = 128
SUBLANE = 8


def _round_up(x, m):
    return ((x + m - 1) // m) * m


# ----------------------------------------------------------------------------
# Kernel: the whole 3-layer MLP (2 ReLUs, 3 matmuls, bias adds) in one body.
# ----------------------------------------------------------------------------
def critic_kernel(state_ref, action_ref, params_ref, q_ref, *,
                  n_state, n_action, W, W_out,
                  r_w1s, r_w1a, r_w2, r_w3, r_w3t, r_bias, lane_major_out):
    cdt = params_ref.dtype                        # matmul dtype (f32 or bf16)
    state = state_ref[...].astype(cdt)            # (TB, n_state)
    action = action_ref[...].astype(cdt)          # (TB, n_action)

    # Static slices into the packed parameter slab (zero runtime cost).
    w1s = params_ref[r_w1s:r_w1s + n_state, :]    # (n_state,  W)
    w1a = params_ref[r_w1a:r_w1a + n_action, :]   # (n_action, W)
    w2 = params_ref[r_w2:r_w2 + W, :]             # (W, W)   zero-padded
    b1 = params_ref[r_bias + 0:r_bias + 1, :].astype(jnp.float32)   # (1, W)
    b2 = params_ref[r_bias + 1:r_bias + 2, :].astype(jnp.float32)   # (1, W)

    # Layer 1 with the concat fused: x @ W1 == state @ W1[:ns] + action @ W1[ns:]
    h1 = (jnp.dot(state, w1s, preferred_element_type=jnp.float32)
          + jnp.dot(action, w1a, preferred_element_type=jnp.float32)
          + b1)
    h1 = jnp.maximum(h1, 0.0)

    # Layer 2 (bias add + ReLU stay in f32 on the VPU).
    h2 = jnp.maximum(
        jnp.dot(h1.astype(cdt), w2, preferred_element_type=jnp.float32) + b2, 0.0)
    h2 = h2.astype(cdt)

    if lane_major_out:
        # n_out == 1 fast path: write Q batch-major on lanes -> (1, 1, TB) block.
        # qt = w3t @ h2^T via a trans_b dot_general (MXU, no explicit transpose).
        w3t = params_ref[r_w3t:r_w3t + SUBLANE, :]            # (8, W), row 0 = w3[:, 0]
        qt = jax.lax.dot_general(w3t, h2, (((1,), (1,)), ((), ())),
                                 preferred_element_type=jnp.float32)  # (8, TB)
        b3_row = params_ref[r_bias + 2:r_bias + 3, :].astype(jnp.float32)  # (1, W)
        q_ref[...] = (qt[0:1, :] + b3_row[:, 0:1]).reshape(q_ref.shape)
    else:
        # General path: lane-padded (TB, W_out) output, W_out << W hidden width.
        w3 = params_ref[r_w3:r_w3 + W, :W_out]                # (W, W_out)
        b3 = params_ref[r_bias + 2:r_bias + 3, :W_out].astype(jnp.float32)
        q_ref[...] = jnp.dot(h2, w3, preferred_element_type=jnp.float32) + b3


# ----------------------------------------------------------------------------
# Parameter packing: one (P, W) slab holds w1_state, w1_action, w2, w3,
# a transposed copy of w3's first column, and the three bias rows,
# all zero-padded to 128 lanes / 8-row tiles.
# ----------------------------------------------------------------------------
def pack_params(params, n_state, n_action, dtype=jnp.float32):
    w1, b1, w2, b2, w3, b3 = params
    n_input, nf = w1.shape
    n_out = w3.shape[1]
    assert n_input == n_state + n_action

    W = max(_round_up(nf, LANE), _round_up(n_out, LANE))   # hidden lane width
    W_out = _round_up(n_out, LANE)                         # output lane width
    rows_s = _round_up(n_state, SUBLANE)
    rows_a = _round_up(n_action, SUBLANE)
    r_w1s = 0
    r_w1a = rows_s
    r_w2 = rows_s + rows_a
    r_w3 = r_w2 + W
    r_w3t = r_w3 + W
    r_bias = r_w3t + SUBLANE
    P = r_bias + SUBLANE

    slab = jnp.zeros((P, W), jnp.float32)
    slab = slab.at[r_w1s:r_w1s + n_state, :nf].set(w1[:n_state].astype(jnp.float32))
    slab = slab.at[r_w1a:r_w1a + n_action, :nf].set(w1[n_state:].astype(jnp.float32))
    slab = slab.at[r_w2:r_w2 + nf, :nf].set(w2.astype(jnp.float32))
    slab = slab.at[r_w3:r_w3 + nf, :n_out].set(w3.astype(jnp.float32))
    slab = slab.at[r_w3t, :nf].set(w3[:, 0].astype(jnp.float32))       # for n_out==1 path
    slab = slab.at[r_bias + 0, :nf].set(b1.reshape(-1).astype(jnp.float32))
    slab = slab.at[r_bias + 1, :nf].set(b2.reshape(-1).astype(jnp.float32))
    slab = slab.at[r_bias + 2, :n_out].set(b3.reshape(-1).astype(jnp.float32))
    slab = slab.astype(dtype)   # bf16 halves the slab DMA; matmuls run on the bf16 MXU

    meta = dict(n_state=n_state, n_action=n_action, n_out=n_out, W=W, W_out=W_out,
                r_w1s=r_w1s, r_w1a=r_w1a, r_w2=r_w2, r_w3=r_w3, r_w3t=r_w3t,
                r_bias=r_bias)
    return slab, meta


# ----------------------------------------------------------------------------
# Forward pass wrapper.
# ----------------------------------------------------------------------------
def critic_forward(state, action, packed_params):
    slab, meta = packed_params
    state = state.astype(jnp.float32)
    action = action.astype(jnp.float32)

    B = state.shape[0]
    W = meta["W"]
    W_out = meta["W_out"]
    n_state = meta["n_state"]
    n_action = meta["n_action"]
    n_out = meta["n_out"]
    lane_major_out = (n_out == 1)

    # Batch tiling: single block for small batches; otherwise >= 2 large tiles
    # (keeps both v7x TensorCores busy under the "parallel" axis, amortizes the
    # ~0.35us/step pipeline overhead, and limits batch padding).
    if B <= 256:
        TB = _round_up(B, SUBLANE)
        G = 1
    else:
        G = max(2, -(-B // 1024))              # tiles of at most ~1024 rows
        TB = _round_up(-(-B // G), SUBLANE)
        G = -(-B // TB)
    B_pad = G * TB
    if B_pad != B:
        pad = B_pad - B
        state = jnp.pad(state, ((0, pad), (0, 0)))
        action = jnp.pad(action, ((0, pad), (0, 0)))

    kernel = functools.partial(
        critic_kernel,
        n_state=n_state, n_action=n_action, W=W, W_out=W_out,
        r_w1s=meta["r_w1s"], r_w1a=meta["r_w1a"], r_w2=meta["r_w2"],
        r_w3=meta["r_w3"], r_w3t=meta["r_w3t"], r_bias=meta["r_bias"],
        lane_major_out=lane_major_out)

    if lane_major_out:
        # Batch-major-on-lanes output: (G, 1, TB), every stored lane is a real Q.
        out_shape = jax.ShapeDtypeStruct((G, 1, TB), jnp.float32)
        out_spec = pl.BlockSpec((1, 1, TB), lambda i: (i, 0, 0))
        out_cols = 1
        layer3_cols = SUBLANE
    else:
        out_shape = jax.ShapeDtypeStruct((B_pad, W_out), jnp.float32)
        out_spec = pl.BlockSpec((TB, W_out), lambda i: (i, 0))
        out_cols = W_out
        layer3_cols = W_out

    cost = pl.CostEstimate(
        flops=int(2 * B_pad * ((n_state + n_action) * W + W * W + W * layer3_cols)),
        transcendentals=0,
        bytes_accessed=int((state.size + action.size) * 4
                           + slab.size * slab.dtype.itemsize
                           + B_pad * out_cols * 4))

    q_pad = pl.pallas_call(
        kernel,
        out_shape=out_shape,
        grid_spec=pltpu.PrefetchScalarGridSpec(
            num_scalar_prefetch=0,
            grid=(G,),
            in_specs=[
                pl.BlockSpec((TB, n_state), lambda i: (i, 0)),   # state tile
                pl.BlockSpec((TB, n_action), lambda i: (i, 0)),  # action tile
                pl.BlockSpec(slab.shape, lambda i: (0, 0)),      # packed params (grid-invariant)
            ],
            out_specs=out_spec,
        ),
        compiler_params=pltpu.CompilerParams(
            dimension_semantics=("parallel",)),
        cost_estimate=cost,
    )(state, action, slab)

    if lane_major_out:
        q = q_pad.reshape(-1)[:B]
    else:
        q = q_pad[:B, :n_out]
    # torch.squeeze semantics (removes ALL size-1 dims).
    return jnp.squeeze(q)


# ----------------------------------------------------------------------------
# Initialization (matches the PyTorch module) + pure-JAX reference.
# ----------------------------------------------------------------------------
def xavier_uniform(key, fan_in, fan_out, gain):
    bound = gain * math.sqrt(6.0 / (fan_in + fan_out))
    # stored (in, out) so forward is x @ W  (same math as PyTorch's x @ W^T)
    return jax.random.uniform(key, (fan_in, fan_out), jnp.float32, -bound, bound)


def linear_bias(key, fan_in, fan_out):
    bound = 1.0 / math.sqrt(fan_in)
    return jax.random.uniform(key, (1, fan_out), jnp.float32, -bound, bound)


def init_params(key, n_input, n_features, n_output):
    k1, k2, k3, k4, k5, k6 = jax.random.split(key, 6)
    gain_relu = math.sqrt(2.0)   # nn.init.calculate_gain('relu')
    gain_lin = 1.0               # nn.init.calculate_gain('linear')
    w1 = xavier_uniform(k1, n_input, n_features, gain_relu)
    b1 = linear_bias(k2, n_input, n_features)
    w2 = xavier_uniform(k3, n_features, n_features, gain_relu)
    b2 = linear_bias(k4, n_features, n_features)
    w3 = xavier_uniform(k5, n_features, n_output, gain_lin)
    b3 = linear_bias(k6, n_features, n_output)
    return (w1, b1, w2, b2, w3, b3)


def critic_reference(state, action, params):
    w1, b1, w2, b2, w3, b3 = params
    x = jnp.concatenate(
        [state.astype(jnp.float32), action.astype(jnp.float32)], axis=1)
    h1 = jnp.maximum(x @ w1 + b1, 0.0)
    h2 = jnp.maximum(h1 @ w2 + b2, 0.0)
    q = h2 @ w3 + b3
    return jnp.squeeze(q)


if __name__ == "__main__":
    n_state, n_action = 6, 2
    n_input = n_state + n_action
    n_features = 32

    key = jax.random.PRNGKey(0)
    k_params, k_state, k_action, k_params3, k_state_l, k_action_l = jax.random.split(key, 6)

    # ---- Test 1: n_output=1 (SAC critic), f32 slab, small batch (single block) ----
    params = init_params(k_params, n_input, n_features, 1)
    packed_f32 = pack_params(params, n_state, n_action, dtype=jnp.float32)
    state = jax.random.normal(k_state, (8, n_state), jnp.float32)
    action = jax.random.normal(k_action, (8, n_action), jnp.float32)
    q = jax.block_until_ready(critic_forward(state, action, packed_f32))
    q_ref = critic_reference(state, action, params)
    assert q.shape == (8,), f"unexpected output shape {q.shape}"
    assert jnp.allclose(q, q_ref, atol=1e-5, rtol=1e-5), "f32 small-batch mismatch"

    # ---- Test 2: f32 slab, tiled multi-step grid (lane-major output path) ----
    state_l = jax.random.normal(k_state_l, (260, n_state), jnp.float32)
    action_l = jax.random.normal(k_action_l, (260, n_action), jnp.float32)
    q_l = jax.block_until_ready(critic_forward(state_l, action_l, packed_f32))
    q_l_ref = critic_reference(state_l, action_l, params)
    assert q_l.shape == (260,), f"unexpected output shape {q_l.shape}"
    assert jnp.allclose(q_l, q_l_ref, atol=1e-5, rtol=1e-5), "f32 tiled mismatch"

    # ---- Test 3: bf16 weight slab (bf16 MXU matmuls, f32 accumulation) ----
    packed_bf16 = pack_params(params, n_state, n_action, dtype=jnp.bfloat16)
    q_b = jax.block_until_ready(critic_forward(state_l, action_l, packed_bf16))
    assert q_b.shape == (260,), f"unexpected output shape {q_b.shape}"
    assert jnp.allclose(q_b, q_l_ref, atol=5e-2, rtol=5e-2), "bf16 mismatch"

    # ---- Test 4: n_output > 1 general (lane-padded) output path ----
    params3 = init_params(k_params3, n_input, n_features, 3)
    packed3 = pack_params(params3, n_state, n_action, dtype=jnp.float32)
    q3 = jax.block_until_ready(critic_forward(state, action, packed3))
    q3_ref = critic_reference(state, action, params3)
    assert q3.shape == (8, 3), f"unexpected output shape {q3.shape}"
    assert jnp.allclose(q3, q3_ref, atol=1e-5, rtol=1e-5), "n_out>1 mismatch"

    print("KERNEL_OK")
</pallas_src>

<mosaic_0001>
module attributes {stable_mosaic.version = 11 : i64} {
  func.func @critic_kernel(%arg0: i32, %arg1: memref<8x6xf32, #tpu.memory_space<vmem>>, %arg2: memref<8x2xf32, #tpu.memory_space<vmem>>, %arg3: memref<288x128xf32, #tpu.memory_space<vmem>>, %arg4: memref<1x1x8xf32, #tpu.memory_space<vmem>>) attributes {dimension_semantics = [#tpu.dimension_semantics<parallel>], iteration_bounds = array<i64: 1>, scalar_prefetch = 0 : i64, scratch_operands = 0 : i64, tpu.core_type = #tpu.core_type<tc>, window_params = [{transform_indices = @transform_0, window_bounds = array<i64: 8, 6>}, {transform_indices = @transform_1, window_bounds = array<i64: 8, 2>}, {pipeline_mode = #tpu.pipeline_mode<synchronous>, transform_indices = @transform_2, window_bounds = array<i64: 288, 128>}, {transform_indices = @transform_3, window_bounds = array<i64: 1, 1, 8>}]} {
    %c0 = arith.constant 0 : index
    %c0_0 = arith.constant 0 : index
    %0 = vector.load %arg1[%c0, %c0_0] : memref<8x6xf32, #tpu.memory_space<vmem>>, vector<8x6xf32>
    %c0_1 = arith.constant 0 : index
    %c0_2 = arith.constant 0 : index
    %1 = vector.load %arg2[%c0_1, %c0_2] : memref<8x2xf32, #tpu.memory_space<vmem>>, vector<8x2xf32>
    %c0_3 = arith.constant 0 : index
    %c0_4 = arith.constant 0 : index
    %2 = vector.load %arg3[%c0_3, %c0_4] : memref<288x128xf32, #tpu.memory_space<vmem>>, vector<6x128xf32>
    %c8 = arith.constant 8 : index
    %c0_5 = arith.constant 0 : index
    %3 = vector.load %arg3[%c8, %c0_5] : memref<288x128xf32, #tpu.memory_space<vmem>>, vector<2x128xf32>
    %c16 = arith.constant 16 : index
    %c0_6 = arith.constant 0 : index
    %4 = vector.load %arg3[%c16, %c0_6] : memref<288x128xf32, #tpu.memory_space<vmem>>, vector<128x128xf32>
    %c280 = arith.constant 280 : index
    %c0_7 = arith.constant 0 : index
    %5 = vector.load %arg3[%c280, %c0_7] : memref<288x128xf32, #tpu.memory_space<vmem>>, vector<1x128xf32>
    %c281 = arith.constant 281 : index
    %c0_8 = arith.constant 0 : index
    %6 = vector.load %arg3[%c281, %c0_8] : memref<288x128xf32, #tpu.memory_space<vmem>>, vector<1x128xf32>
    %cst = arith.constant dense<0.000000e+00> : vector<8x128xf32>
    %7 = tpu.matmul %0, %2, %cst {dimension_numbers = #tpu.dot_dimension_numbers<[1], [0], [0], [1], [0, 0, 1, 1], [], []>} : vector<8x6xf32>, vector<6x128xf32>, vector<8x128xf32> -> vector<8x128xf32>
    %cst_9 = arith.constant dense<0.000000e+00> : vector<8x128xf32>
    %8 = tpu.matmul %1, %3, %cst_9 {dimension_numbers = #tpu.dot_dimension_numbers<[1], [0], [0], [1], [0, 0, 1, 1], [], []>} : vector<8x2xf32>, vector<2x128xf32>, vector<8x128xf32> -> vector<8x128xf32>
    %9 = arith.addf %7, %8 : vector<8x128xf32>
    %10 = vector.broadcast %5 : vector<1x128xf32> to vector<8x128xf32>
    %11 = arith.addf %9, %10 : vector<8x128xf32>
    %cst_10 = arith.constant 0.000000e+00 : f32
    %12 = vector.broadcast %cst_10 : f32 to vector<8x128xf32>
    %13 = arith.maximumf %11, %12 : vector<8x128xf32>
    %cst_11 = arith.constant dense<0.000000e+00> : vector<8x128xf32>
    %14 = tpu.matmul %13, %4, %cst_11 {dimension_numbers = #tpu.dot_dimension_numbers<[1], [0], [0], [1], [0, 0, 1, 1], [], []>} : vector<8x128xf32>, vector<128x128xf32>, vector<8x128xf32> -> vector<8x128xf32>
    %15 = vector.broadcast %6 : vector<1x128xf32> to vector<8x128xf32>
    %16 = arith.addf %14, %15 : vector<8x128xf32>
    %cst_12 = arith.constant 0.000000e+00 : f32
    %17 = vector.broadcast %cst_12 : f32 to vector<8x128xf32>
    %18 = arith.maximumf %16, %17 : vector<8x128xf32>
    %c272 = arith.constant 272 : index
    %c0_13 = arith.constant 0 : index
    %19 = vector.load %arg3[%c272, %c0_13] : memref<288x128xf32, #tpu.memory_space<vmem>>, vector<8x128xf32>
    %cst_14 = arith.constant dense<0.000000e+00> : vector<8x8xf32>
    %20 = tpu.matmul %19, %18, %cst_14 {dimension_numbers = #tpu.dot_dimension_numbers<[1], [1], [0], [0], [0, 0, 1, 0], [], []>} : vector<8x128xf32>, vector<8x128xf32>, vector<8x8xf32> -> vector<8x8xf32>
    %c282 = arith.constant 282 : index
    %c0_15 = arith.constant 0 : index
    %21 = vector.load %arg3[%c282, %c0_15] : memref<288x128xf32, #tpu.memory_space<vmem>>, vector<1x128xf32>
    %22 = vector.extract_strided_slice %20 {offsets = [0, 0], sizes = [1, 8], strides = [1, 1]} : vector<8x8xf32> to vector<1x8xf32>
    %23 = vector.extract_strided_slice %21 {offsets = [0, 0], sizes = [1, 1], strides = [1, 1]} : vector<1x128xf32> to vector<1x1xf32>
    %24 = vector.broadcast %23 : vector<1x1xf32> to vector<1x8xf32>
    %25 = arith.addf %22, %24 : vector<1x8xf32>
    %26 = vector.shape_cast %25 : vector<1x8xf32> to vector<1x1x8xf32>
    %c0_16 = arith.constant 0 : index
    %c0_17 = arith.constant 0 : index
    %c0_18 = arith.constant 0 : index
    %27 = vector.load %arg4[%c0_16, %c0_17, %c0_18] : memref<1x1x8xf32, #tpu.memory_space<vmem>>, vector<1x1x8xf32>
    tpu.vector_store %arg4[%c0_16, %c0_17, %c0_18], %26 {strides = array<i32>} : memref<1x1x8xf32, #tpu.memory_space<vmem>>, vector<1x1x8xf32>,
    return
  }
  func.func @transform_0(%arg0: i32) -> (i32, i32) {
    %c0_i32 = arith.constant 0 : i32
    %c0_i32_0 = arith.constant 0 : i32
    return %arg0, %c0_i32 : i32, i32
  }
  func.func @transform_1(%arg0: i32) -> (i32, i32) {
    %c0_i32 = arith.constant 0 : i32
    %c0_i32_0 = arith.constant 0 : i32
    return %arg0, %c0_i32 : i32, i32
  }
  func.func @transform_2(%arg0: i32) -> (i32, i32) {
    %c0_i32 = arith.constant 0 : i32
    %c0_i32_0 = arith.constant 0 : i32
    %c0_i32_1 = arith.constant 0 : i32
    return %c0_i32, %c0_i32_0 : i32, i32
  }
  func.func @transform_3(%arg0: i32) -> (i32, i32, i32) {
    %c0_i32 = arith.constant 0 : i32
    %c0_i32_0 = arith.constant 0 : i32
    %c0_i32_1 = arith.constant 0 : i32
    return %arg0, %c0_i32, %c0_i32_0 : i32, i32, i32
  }
}

</mosaic_0001>

<bundles_post_ra>
// kernel: tpu_custom_call.1
= control target key start
LH: loop header
LB: loop body
LE: loop exit
PB: predicated region body
PF: predicated region fallthrough
CT: control target
= control target key end

     0   :  { %8 = vsyncpa [#allocation3], 0  ;;  %s605_s0 = inlined_call_operand.vmem [shape: f32[8,6], index: 0, kind: input, shape index: {}]   ;;  %s606_s1 = inlined_call_operand.vmem [shape: f32[8,2], index: 1, kind: input, shape index: {}]   ;;  %s607_s2 = inlined_call_operand.hbm [shape: f32[288,128], index: 2, kind: input, shape index: {}]   ;;  %s608_s3 = inlined_call_operand.hbm [shape: f32[1,1,8], index: 3, kind: output, shape index: {}]  }
   0x1   :  { %9 = vsyncpa [#allocation4], 0  ;;  %s543_s12 = smov [#allocation2]   ;;  %s495_s16 = scalar_lea.hbm %s607_s2, 4608 }
   0x2   :  { %s19_s13 = sshll.u32 %s543_s12, 4  ;;  %p496_p0 = scmp.ne.s32.totalorder %s607_s2, %s495_s16  ;;  %s20_s13 = int_to_ptr.vmem [resolvable:$true] %s19_s13 }
   0x3   :  { %p499_p1 = scmp.lt.u32.totalorder %s495_s16, %s607_s2 }
   0x5   :  { %p501_p2 = pnand %p499_p1, %p496_p0 }
   0x7   :  { %504 = shalt.err (!%p501_p2)
}
   0x8   :  { %s505_s21 = scalar_lea.vmem %s20_s13, 4608  ;;  %p510_p4 = scmp.lt.s32.totalorder %s20_s13, %s20_s13 }
   0x9   :  { %p506_p3 = scmp.ne.s32.totalorder %s20_s13, %s505_s21  ;;  %p511_p5 = scmp.lt.s32.totalorder %s505_s21, %s505_s21 }
   0xb   :  { %p512_p6 = por %p511_p5, %p510_p4 }
   0xd   :  { %p513_p7 = pnand %p512_p6, %p506_p3 }
   0xf   :  { %516 = shalt.err (!%p513_p7)
}
  0x10   :  { %s544_s22 = smov 128   ;;  %s545_s23 = smov 8  }
  0x11   :  { %25 = dma.hbm_to_vmem [thread:$0]  %s607_s2, 4608, %s20_s13, [#allocation3], %s544_s22, %s544_s22, %s545_s23  }
  0x12   :  { %539 = dma.done.wait [#allocation3], 4608  }
  0x13   :  { %540 = vsyncadd [#allocation3], 4294962688  ;;  %v546_v0 = vmov 0.0   ;;  %vm547_vm0 = vmmov 0   ;;  %v548_v1 = vmov 0.0|0.0   ;;  %vm55_vm1 = vcmask 1041408  }
  0x14   :  { %412 = vmatprep.subr.mxu1 %v546_v0  ;;  %414 = vmatprep.mubr.msk.f32.mxu1 %vm547_vm0, %v546_v0  ;;  %vm51_vm2 = vcmask 15360   ;;  %v32_v2 = vld [vmem:[#allocation2 + $0x8] sm:$0x3]  ;;  %v30_v3 = vld [vmem:[%s606_s1] sm:$0xff]  ;;  %vm133_vm3 = vcmask 1045504   ;;  %v33_v5 = vld [vmem:[#allocation2 + $0x10] sm:$0xff] }
  0x15   :  { %462 = vmatprep.subr.bf16.mxu0 %v548_v1  ;;  %454 = vmatprep.mubr.msk.f32.mxu0 %vm547_vm0, %v546_v0  ;;  %v31_v4 = vld [vmem:[#allocation2] sm:$0x3f]  ;;  %v34_v6 = vld [vmem:[#allocation2 + $0x18] sm:$0xff]  ;;  %v36_v9 = vld [vmem:[#allocation2 + $0x28] sm:$0xff]  ;;  %vm129_vm4 = vcmask 48128   ;;  %v549_v39 = vmov 0  }
  0x16   :  { %413 = vmatpush3.msk.msra.mxu1 %vm55_vm1, %v32_v2  ;;  %v463_v7 = vpack.c.bf16 %v34_v6, %v33_v5  ;;  %v35_v8 = vld [vmem:[#allocation2 + $0x20] sm:$0xff]  ;;  %v37_v12 = vld [vmem:[#allocation2 + $0x30] sm:$0xff]  ;;  %v38_v13 = vld [vmem:[#allocation2 + $0x38] sm:$0xff]  ;;  %494 = vset.pattern.permute.xlu0 %v549_v39  ;;  %vm366_vm5 = vcmask 57344  }
  0x17   :  { %415 = vmatmul.mubr.msk.f32.vlgmr.msra.gmra.mrb[0].mxu1 %vm51_vm2, %v30_v3  ;;  %417 = vmatprep.subr.mxu1 %v546_v0  ;;  %v29_v10 = vld [vmem:[%s605_s0] sm:$0xff]  ;;  %v466_v11 = vpack.c.bf16 %v36_v9, %v35_v8  ;;  %v469_v14 = vpack.c.bf16 %v38_v13, %v37_v12  ;;  %v40_v16 = vld [vmem:[#allocation2 + $0x48] sm:$0xff]  ;;  %v41_v18 = vld [vmem:[#allocation2 + $0x50] sm:$0xff]  ;;  %s550_s0 = smov [#allocation5]  }
  0x18   :  { %418 = vmatpush3.msk.msra.mxu1 %vm133_vm3, %v31_v4  ;;  %419 = vmatprep.mubr.msk.f32.mxu1 %vm547_vm0, %v546_v0  ;;  %v39_v15 = vld [vmem:[#allocation2 + $0x40] sm:$0xff]  ;;  %v42_v19 = vld [vmem:[#allocation2 + $0x58] sm:$0xff]  ;;  %v44_v22 = vld [vmem:[#allocation2 + $0x68] sm:$0xff]  ;;  %s374_s1 = sshll.u32 %s550_s0, 4  ;;  %s375_s1 = int_to_ptr.vmem [resolvable:$true] %s374_s1 }
  0x19   :  { %464 = vmatpush3.bf16.msra.mxu0 %v463_v7  ;;  %457 = vmatprep.subr.mxu1 %v546_v0  ;;  %v472_v17 = vpack.c.bf16 %v40_v16, %v39_v15  ;;  %v475_v20 = vpack.c.bf16 %v42_v19, %v41_v18  ;;  %v43_v21 = vld [vmem:[#allocation2 + $0x60] sm:$0xff]  ;;  %v45_v24 = vld [vmem:[#allocation2 + $0x70] sm:$0xff]  ;;  %v46_v25 = vld [vmem:[#allocation2 + $0x78] sm:$0xff]  ;;  %s517_s29 = scalar_lea.vmem %s375_s1, 16  ;;  %s521_s30 = scalar_lea.vmem %s375_s1, 32 }
  0x1a   :  { %465 = vmatprep.subr.bf16.mxu0 %v548_v1  ;;  %v478_v23 = vpack.c.bf16 %v44_v22, %v43_v21  ;;  %v481_v26 = vpack.c.bf16 %v46_v25, %v45_v24  ;;  %v47_v27 = vld [vmem:[#allocation2 + $0x80] sm:$0xff]  ;;  %v48_v28 = vld [vmem:[#allocation2 + $0x88] sm:$0xff]  ;;  %v387_v32 = vld [vmem:[#allocation2 + $0x118] ss:$0 sm:$0xff]  ;;  %p518_p8 = scmp.ne.s32.totalorder %s375_s1, %s517_s29  ;;  %p522_p9 = scmp.lt.s32.totalorder %s375_s1, %s375_s1 }
  0x1b   :  { %420 = vmatmul.mubr.msk.f32.vlgmr.msra.gmra.mrb[2].mxu1 %vm129_vm4, %v29_v10  ;;  %v484_v29 = vpack.c.bf16 %v48_v28, %v47_v27  ;;  %v359_v38 = vld [vmem:[#allocation2 + $0x11a] sm:$0x1]  ;;  %v388_v40 = vld [vmem:[#allocation2 + $0x119] ss:$0 sm:$0xff]  ;;  %v288_v45 = vld [vmem:[#allocation2 + $0x110] sm:$0xff]  ;;  %p523_p10 = scmp.lt.s32.totalorder %s521_s30, %s517_s29 }
  0x1c   :  { %459 = vmatprep.mubr.msk.f32.mxu1 %vm547_vm0, %v546_v0  ;;  %362 = vperm.xlu0 %494, %v359_v38  }
  0x1d   :  { %467 = vmatpush3.bf16.msra.mxu0 %v466_v11  ;;  %p524_p11 = por %p523_p10, %p522_p9 }
  0x1e   :  { %468 = vmatprep.subr.bf16.mxu0 %v548_v1 }
  0x1f   :  { %p525_p12 = pnand %p524_p11, %p518_p8 }
  0x21   :  { %470 = vmatpush3.bf16.msra.mxu0 %v469_v14 }
  0x22   :  { %471 = vmatprep.subr.bf16.mxu0 %v548_v1 }
  0x25   :  { %473 = vmatpush3.bf16.msra.mxu0 %v472_v17 }
  0x26   :  { %474 = vmatprep.subr.bf16.mxu0 %v548_v1 }
  0x29   :  { %476 = vmatpush3.bf16.msra.mxu0 %v475_v20 }
  0x2a   :  { %477 = vmatprep.subr.bf16.mxu0 %v548_v1 }
  0x2d   :  { %479 = vmatpush3.bf16.msra.mxu0 %v478_v23 }
  0x2e   :  { %480 = vmatprep.subr.bf16.mxu0 %v548_v1 }
  0x31   :  { %482 = vmatpush3.bf16.msra.mxu0 %v481_v26 }
  0x32   :  { %483 = vmatprep.subr.bf16.mxu0 %v548_v1 }
  0x35   :  { %485 = vmatpush3.bf16.msra.mxu0 %v484_v29 }
  0x9b   :  { %v363_v46 = vpop.permute.xlu0 %362 }
  0xea   :  { %v125_v30 = vpop.f32.mrb[0].mxu1 }
  0xeb   :  { %v416_v31 = vpop.f32.mrb[1].mxu1 }
  0xee   :  { %v203_v33 = vpop.f32.mrb[2].mxu1 }
  0xef   :  { %v204_v34 = vadd.f32 %v203_v33, %v125_v30  ;;  %v421_v35 = vpop.f32.mrb[3].mxu1 }
  0xf1   :  { %v211_v36 = vadd.f32 %v387_v32, %v204_v34 }
  0xf3   :  { %v212_v37 = vmax.f32 %v211_v36, 0.0 }
  0xf5   :  { %455 = vmatmul.mubr.f32.vlgmr.msra.gmra.mrb[0].mxu0 %v212_v37 }
 0x1c8   :  { %v283_v41 = vpop.f32.mrb[0].mxu0 }
 0x1c9   :  { %v284_v42 = vadd.f32 %v388_v40, %v283_v41  ;;  %v456_v43 = vpop.f32.mrb[1].mxu0 }
 0x1cb   :  { %v287_v44 = vmax.f32 %v284_v42, 0.0 }
 0x1cd   :  { %458 = vmatpush3.xpose.msra.mxu1 %v287_v44 }
 0x1d0   :  { %460 = vmatmul.mubr.f32.vlgmr.msra.gmra.mrb[4].mxu1 %v288_v45 }
 0x2a3   :  { %v355_v47 = vpop.f32.mrb[4].mxu1 }
 0x2a4   :  { %v365_v48 = vadd.f32 %v363_v46, %v355_v47  ;;  %v461_v49 = vpop.f32.mrb[5].mxu1 }
 0x2a6   :  { %367 = vst.msk [vmem:[#allocation5] sm:$0x1] %vm366_vm5, %v365_v48 }
 0x2a7   :  { %528 = shalt.err (!%p525_p12)
}
 0x2a8   :  { %s529_s6 = scalar_lea.hbm %s608_s3, 16 }
 0x2a9   :  { %p530_p13 = scmp.ne.s32.totalorder %s608_s3, %s529_s6  ;;  %p533_p0 = scmp.lt.u32.totalorder %s529_s6, %s608_s3 }
 0x2ab   :  { %p535_p1 = pnand %p533_p0, %p530_p13 }
 0x2ad   :  { %538 = shalt.err (!%p535_p1)
}
 0x2ae   :  { %377 = dma.vmem_to_hbm [thread:$0]  %s375_s1, 16, %s608_s3, [#allocation4]  }
 0x2af   :  { %541 = dma.done.wait [#allocation4], 16  }
 0x2b0   :  { %542 = vsyncadd [#allocation4], 4294967280 }
 0x2b1   :  { %381 = vsyncpa [#allocation3], 1 }
 0x2b2   :  { %382 = vsyncpa [#allocation4], 1 }

</bundles_post_ra>
